<compile_context>
chip_gen: v6e
topology: v6e:2x2x1
jax: 0.10.0
libtpu: 0.0.40
codegen_flags: <defaults>
</compile_context>

<pallas_src>
import functools

import jax
import jax.numpy as jnp
from jax.experimental import pallas as pl
from jax.experimental.pallas import tpu as pltpu

_HID = 16

# Row layout of the packed parameter slab (width = max(state_dim, 16)).
_R_W1 = 0    # rows  0:16, cols 0:S  -> fc1.weight (16, S)  (torch (out, in) layout)
_R_W2 = 16   # rows 16:32, cols 0:16 -> fc2.weight (16, 16)
_R_W3 = 32   # row  32,    cols 0:16 -> fc3.weight (1, 16)
_R_B1 = 40   # rows 40:56, col 0     -> fc1.bias as a (16, 1) column
_R_B2 = 56   # rows 56:72, col 0     -> fc2.bias as a (16, 1) column
_R_B3 = 72   # row  72,    col 0     -> fc3.bias   (1, 1)
_P_ROWS = 80


def _round_up(x, m):
    return ((x + m - 1) // m) * m


def _critic_kernel(x_ref, p_ref, o_ref):
    # x_ref: (tm, S) tile of states.  p_ref: (80, W) packed params (resident).
    # o_ref: (1, tm) lane-dense value tile.
    x = x_ref[...]
    s_dim = x.shape[1]
    w1 = p_ref[_R_W1:_R_W1 + _HID, 0:s_dim]      # (16, S)
    w2 = p_ref[_R_W2:_R_W2 + _HID, 0:_HID]       # (16, 16)
    w3 = p_ref[_R_W3:_R_W3 + 1, 0:_HID]          # (1, 16)
    b1 = p_ref[_R_B1:_R_B1 + _HID, 0:1]          # (16, 1)
    b2 = p_ref[_R_B2:_R_B2 + _HID, 0:1]          # (16, 1)
    b3 = p_ref[_R_B3:_R_B3 + 1, 0:1]             # (1, 1)

    # fc1 + relu: contract the feature dim of both operands -> (16, tm).
    # Batch maps to lanes from here on (lane-dense VPU work + store).
    h = jax.lax.dot_general(w1, x, (((1,), (1,)), ((), ())),
                            preferred_element_type=jnp.float32)
    h = jnp.maximum(h + b1, 0.0)
    # fc2 + relu: (16, 16) @ (16, tm) -> (16, tm)
    h = jnp.dot(w2, h, preferred_element_type=jnp.float32)
    h = jnp.maximum(h + b2, 0.0)
    # fc3 (value head, no activation): (1, 16) @ (16, tm) -> (1, tm)
    v = jnp.dot(w3, h, preferred_element_type=jnp.float32) + b3
    o_ref[...] = v.astype(o_ref.dtype)


def pack_params(params, state_dim):
    """Pack all six Linear params (torch (out, in) layout) into one f32 slab."""
    width = max(state_dim, _HID)
    p = jnp.zeros((_P_ROWS, width), jnp.float32)
    p = p.at[_R_W1:_R_W1 + _HID, 0:state_dim].set(params["w1"])
    p = p.at[_R_W2:_R_W2 + _HID, 0:_HID].set(params["w2"])
    p = p.at[_R_W3:_R_W3 + 1, 0:_HID].set(params["w3"])
    p = p.at[_R_B1:_R_B1 + _HID, 0:1].set(params["b1"].reshape(_HID, 1))
    p = p.at[_R_B2:_R_B2 + _HID, 0:1].set(params["b2"].reshape(_HID, 1))
    p = p.at[_R_B3:_R_B3 + 1, 0:1].set(params["b3"].reshape(1, 1))
    return p


@functools.partial(jax.jit, static_argnames=("block_rows",))
def critic_forward(state, packed_params, *, block_rows=512):
    """state: (B, state_dim) float32. Returns (B, 1) float32."""
    B, S = state.shape
    # Batch tile: multiple of 128 so the (1, tm) output store is lane-aligned.
    b_pad = _round_up(B, 128)
    tm = _round_up(min(block_rows, b_pad), 128)
    b_pad = _round_up(b_pad, tm)
    if b_pad != B:
        state = jnp.pad(state, ((0, b_pad - B), (0, 0)))
    grid = (b_pad // tm,)

    cost = pl.CostEstimate(
        flops=2 * b_pad * (S * _HID + _HID * _HID + _HID),
        transcendentals=0,
        bytes_accessed=(b_pad * S + packed_params.size + b_pad) * 4,
    )

    out = pl.pallas_call(
        _critic_kernel,
        out_shape=jax.ShapeDtypeStruct((1, b_pad), jnp.float32),
        grid=grid,
        in_specs=[
            pl.BlockSpec((tm, S), lambda i: (i, 0)),               # streamed states
            pl.BlockSpec(packed_params.shape, lambda i: (0, 0)),   # resident params
        ],
        out_specs=pl.BlockSpec((1, tm), lambda i: (0, i)),         # lane-dense values
        compiler_params=pltpu.CompilerParams(
            dimension_semantics=("parallel",),   # v7x: split batch tiles over 2 TCs
            vmem_limit_bytes=32 * 1024 * 1024,
        ),
        cost_estimate=cost,
    )(state, packed_params)
    return out.reshape(b_pad, 1)[:B]


def init_params(state_dim, key):
    """torch.nn.Linear-style init; weights kept in torch (out, in) layout."""
    def linear(key, fan_in, fan_out):
        kw, kb = jax.random.split(key)
        bound = fan_in ** -0.5
        w = jax.random.uniform(kw, (fan_out, fan_in), jnp.float32, -bound, bound)
        b = jax.random.uniform(kb, (fan_out,), jnp.float32, -bound, bound)
        return w, b

    k1, k2, k3 = jax.random.split(key, 3)
    w1, b1 = linear(k1, state_dim, _HID)
    w2, b2 = linear(k2, _HID, _HID)
    w3, b3 = linear(k3, _HID, 1)
    return {"w1": w1, "b1": b1, "w2": w2, "b2": b2, "w3": w3, "b3": b3}


def critic_ref(state, params):
    """Pure-JAX reference of the PyTorch forward pass (full f32 precision)."""
    hi = jax.lax.Precision.HIGHEST
    h = jnp.maximum(jnp.dot(state, params["w1"].T, precision=hi) + params["b1"], 0.0)
    h = jnp.maximum(jnp.dot(h, params["w2"].T, precision=hi) + params["b2"], 0.0)
    return jnp.dot(h, params["w3"].T, precision=hi) + params["b3"]


if __name__ == "__main__":
    key = jax.random.PRNGKey(0)
    k_params, k_state, k_small = jax.random.split(key, 3)

    batch, state_dim = 256, 32
    params = init_params(state_dim, k_params)
    packed = pack_params(params, state_dim)
    state = jax.random.normal(k_state, (batch, state_dim), jnp.float32)

    out = jax.block_until_ready(critic_forward(state, packed, block_rows=128))
    ref = critic_ref(state, params)
    assert out.shape == (batch, 1), out.shape
    assert jnp.allclose(out, ref, atol=1e-4, rtol=1e-4), float(jnp.max(jnp.abs(out - ref)))

    # Tiny / ragged batches go through the same pad-to-128 path.
    state_small = jax.random.normal(k_small, (8, state_dim), jnp.float32)
    out_small = jax.block_until_ready(critic_forward(state_small, packed))
    ref_small = critic_ref(state_small, params)
    assert out_small.shape == (8, 1), out_small.shape
    assert jnp.allclose(out_small, ref_small, atol=1e-4, rtol=1e-4), float(
        jnp.max(jnp.abs(out_small - ref_small)))

    print("KERNEL_OK")
</pallas_src>

<mosaic_0001>
module attributes {stable_mosaic.version = 11 : i64} {
  func.func @_critic_kernel(%arg0: i32, %arg1: memref<128x32xf32, #tpu.memory_space<vmem>>, %arg2: memref<80x32xf32, #tpu.memory_space<vmem>>, %arg3: memref<1x128xf32, #tpu.memory_space<vmem>>) attributes {dimension_semantics = [#tpu.dimension_semantics<parallel>], iteration_bounds = array<i64: 2>, scalar_prefetch = 0 : i64, scratch_operands = 0 : i64, tpu.core_type = #tpu.core_type<tc>, window_params = [{transform_indices = @transform_0, window_bounds = array<i64: 128, 32>}, {pipeline_mode = #tpu.pipeline_mode<synchronous>, transform_indices = @transform_1, window_bounds = array<i64: 80, 32>}, {transform_indices = @transform_2, window_bounds = array<i64: 1, 128>}]} {
    %c0 = arith.constant 0 : index
    %c0_0 = arith.constant 0 : index
    %0 = vector.load %arg1[%c0, %c0_0] : memref<128x32xf32, #tpu.memory_space<vmem>>, vector<128x32xf32>
    %c0_1 = arith.constant 0 : index
    %c0_2 = arith.constant 0 : index
    %1 = vector.load %arg2[%c0_1, %c0_2] : memref<80x32xf32, #tpu.memory_space<vmem>>, vector<16x32xf32>
    %c16 = arith.constant 16 : index
    %c0_3 = arith.constant 0 : index
    %2 = vector.load %arg2[%c16, %c0_3] : memref<80x32xf32, #tpu.memory_space<vmem>>, vector<16x16xf32>
    %c32 = arith.constant 32 : index
    %c0_4 = arith.constant 0 : index
    %3 = vector.load %arg2[%c32, %c0_4] : memref<80x32xf32, #tpu.memory_space<vmem>>, vector<1x16xf32>
    %c40 = arith.constant 40 : index
    %c0_5 = arith.constant 0 : index
    %4 = vector.load %arg2[%c40, %c0_5] : memref<80x32xf32, #tpu.memory_space<vmem>>, vector<16x1xf32>
    %c56 = arith.constant 56 : index
    %c0_6 = arith.constant 0 : index
    %5 = vector.load %arg2[%c56, %c0_6] : memref<80x32xf32, #tpu.memory_space<vmem>>, vector<16x1xf32>
    %c72 = arith.constant 72 : index
    %c0_7 = arith.constant 0 : index
    %6 = vector.load %arg2[%c72, %c0_7] : memref<80x32xf32, #tpu.memory_space<vmem>>, vector<1x1xf32>
    %cst = arith.constant dense<0.000000e+00> : vector<16x128xf32>
    %7 = tpu.matmul %1, %0, %cst {dimension_numbers = #tpu.dot_dimension_numbers<[1], [1], [0], [0], [0, 0, 1, 0], [], []>} : vector<16x32xf32>, vector<128x32xf32>, vector<16x128xf32> -> vector<16x128xf32>
    %8 = vector.broadcast %4 : vector<16x1xf32> to vector<16x128xf32>
    %9 = arith.addf %7, %8 : vector<16x128xf32>
    %cst_8 = arith.constant 0.000000e+00 : f32
    %10 = vector.broadcast %cst_8 : f32 to vector<16x128xf32>
    %11 = arith.maximumf %9, %10 : vector<16x128xf32>
    %cst_9 = arith.constant dense<0.000000e+00> : vector<16x128xf32>
    %12 = tpu.matmul %2, %11, %cst_9 {dimension_numbers = #tpu.dot_dimension_numbers<[1], [0], [0], [1], [0, 0, 1, 1], [], []>} : vector<16x16xf32>, vector<16x128xf32>, vector<16x128xf32> -> vector<16x128xf32>
    %13 = vector.broadcast %5 : vector<16x1xf32> to vector<16x128xf32>
    %14 = arith.addf %12, %13 : vector<16x128xf32>
    %cst_10 = arith.constant 0.000000e+00 : f32
    %15 = vector.broadcast %cst_10 : f32 to vector<16x128xf32>
    %16 = arith.maximumf %14, %15 : vector<16x128xf32>
    %cst_11 = arith.constant dense<0.000000e+00> : vector<1x128xf32>
    %17 = tpu.matmul %3, %16, %cst_11 {dimension_numbers = #tpu.dot_dimension_numbers<[1], [0], [0], [1], [0, 0, 1, 1], [], []>} : vector<1x16xf32>, vector<16x128xf32>, vector<1x128xf32> -> vector<1x128xf32>
    %18 = vector.broadcast %6 : vector<1x1xf32> to vector<1x128xf32>
    %19 = arith.addf %17, %18 : vector<1x128xf32>
    %c0_12 = arith.constant 0 : index
    %c0_13 = arith.constant 0 : index
    %20 = vector.load %arg3[%c0_12, %c0_13] : memref<1x128xf32, #tpu.memory_space<vmem>>, vector<1x128xf32>
    tpu.vector_store %arg3[%c0_12, %c0_13], %19 {strides = array<i32>} : memref<1x128xf32, #tpu.memory_space<vmem>>, vector<1x128xf32>,
    return
  }
  func.func @transform_0(%arg0: i32) -> (i32, i32) {
    %c0_i32 = arith.constant 0 : i32
    %c0_i32_0 = arith.constant 0 : i32
    return %arg0, %c0_i32 : i32, i32
  }
  func.func @transform_1(%arg0: i32) -> (i32, i32) {
    %c0_i32 = arith.constant 0 : i32
    %c0_i32_0 = arith.constant 0 : i32
    %c0_i32_1 = arith.constant 0 : i32
    return %c0_i32, %c0_i32_0 : i32, i32
  }
  func.func @transform_2(%arg0: i32) -> (i32, i32) {
    %c0_i32 = arith.constant 0 : i32
    %c0_i32_0 = arith.constant 0 : i32
    return %c0_i32, %arg0 : i32, i32
  }
}

</mosaic_0001>

<bundles_post_ra>
// kernel: critic_forward.1
= control target key start
LH: loop header
LB: loop body
LE: loop exit
PB: predicated region body
PF: predicated region fallthrough
CT: control target
= control target key end

     0   :  { %7 = vsyncpa [#allocation3], 0  ;;  %s958_s0 = inlined_call_operand.vmem [shape: f32[256,32], index: 0, kind: input, shape index: {}]   ;;  %s959_s1 = inlined_call_operand.vmem [shape: f32[80,32], index: 1, kind: input, shape index: {}]   ;;  %s960_s2 = inlined_call_operand.hbm [shape: f32[1,256], index: 2, kind: output, shape index: {}]  }
   0x1   :  { %9 = vsyncpa [#allocation3 + $0x1], 0  ;;  %s781_s9 = smov 0   ;;  %s783_s10 = smov 0  }
   0x2   :  { %s785_s11 = smov 0   ;;  %s787_s12 = smov 0  }
   0x3 LB: > { %s551_s13 = sadd.s32 4294967295, %s760_s12   ;;  %s552_s14 = sadd.s32 4294967294, %s760_s12   ;;  %s760_s12 = sphi %s787_s12, %s966_s12   ;;  %s756_s11 = sphi %s785_s11, %s965_s11   ;;  %s752_s10 = sphi %s783_s10, %s964_s10   ;;  %s748_s9 = sphi %s781_s9, %s963_s9  }
   0x4   : > { %s804_s15 = sadd.s32 1, %s760_s12   ;;  %s69_s16 = sadd.s32 1, %s756_s11 }
   0x5   : > { %s66_s17 = ssub.s32 %s760_s12, %s804_s15  ;;  %p79_p0 = scmp.ne.s32.totalorder %s756_s11, %s752_s10 }
   0x6   : > { %p67_p1 = scmp.eq.s32.totalorder %s66_s17, 0  ;;  %p80_p2 = scmp.eq.s32.totalorder %s551_s13, 1 }
   0x7   : > { %p85_p3 = scmp.ne.s32.totalorder %s752_s10, %s748_s9  ;;  %p86_p4 = scmp.eq.s32.totalorder %s552_s14, 1 }
   0x8   : > { %s814_s18 = scalar_select %p67_p1, %s756_s11, %s69_s16  }
   0x9   : > { %p816_p5 = por %p80_p2, %p79_p0  ;;  %p820_p6 = por %p86_p4, %p85_p3 }
   0xa   : > { %p555_p7 = scmp.ge.s32.totalorder %s760_s12, 1  ;;  %p116_p8 = scmp.lt.s32.totalorder %s760_s12, 3 }
   0xc   : > { %p117_p9 = pnand %p555_p7, %p116_p8 }
   0xd   : > { %s826_s21 = sshll.u32 (!%p117_p9), %s551_s13, 4  ;;  %s135_s28 = sand.u32 (!%p117_p9), 1, %s752_s10  }
   0xe   : > { %120 = sbr.rel (%p117_p9) target bundleno = 697 (0x2b9), region = 28  ;;  %p138_p10 = scmp.lt.s32.totalorder (!%p117_p9), %s826_s21, 31 }
   0xf   : > { %s923_s5 = scalar_lea.hbm (!%p117_p9), %s960_s2, %s826_s21  ;;  %s485_s6 = scalar_lea.sflag (!%p117_p9), [#allocation3], %s135_s28 }
  0x10   : > { %s765_s8 = smov (!%p117_p9), [#allocation2]  }
  0x11   : > { %s704_s13 = sshll.u32 (!%p117_p9), %s765_s8, 4  ;;  %s705_s13 = int_to_ptr.vmem [resolvable:$false] %s704_s13 }
  0x12   : > { %s706_s14 = scalar_lea.vmem (!%p117_p9), %s705_s13, 32 }
  0x13   : > { %vm179_vm0 = vcmask 261120   ;;  %v159_v0 = vld [vmem:[%s959_s1] sm:$0xff]  ;;  %v165_v1 = vld [vmem:[%s959_s1 + $0x30] sm:$0xff]  ;;  %v762_v2 = vmov 0   ;;  %s139_s26 = scalar_select %p138_p10, %s826_s21, 31  ;;  %v164_v3 = vld [vmem:[%s959_s1 + $0x28] sm:$0xff] }
  0x14   : > { %639 = vmatprep.mubr.msk.f32.mxu0 %vm179_vm0, %v159_v0  ;;  %698 = vset.pattern.permute.xlu0 %v762_v2  ;;  %v168_v6 = vld [vmem:[%s959_s1 + $0x48] sm:$0x1]  ;;  %v161_v22 = vld [vmem:[%s959_s1 + $0x10] sm:$0xff]  ;;  %vm321_vm1 = vcmask 130048   ;;  %v167_v23 = vld [vmem:[%s959_s1 + $0x40] sm:$0xff]  ;;  %v763_v34 = vmov 0.0  }
  0x15   : > { %176 = vperm.xlu0 %698, %v165_v1   ;;  %699 = vset.pattern.permute.xlu1 %v762_v2  ;;  %s557_s29 = sshll.u32 %s139_s26, 3  ;;  %v160_v21 = vld [vmem:[%s959_s1 + $0x8] sm:$0xff]  ;;  %v166_v24 = vld [vmem:[%s959_s1 + $0x38] sm:$0xff]  ;;  %vm764_vm2 = vmmov 0   ;;  %v163_v43 = vld [vmem:[%s959_s1 + $0x20] sm:$0x1] }
  0x16   : > { %s843_s4 = scalar_lea.vmem %s958_s0, %s557_s29  ;;  %646 = vmatprep.mubr.msk.f32.mxu1 %vm321_vm1, %v161_v22  ;;  %318 = vperm.xlu1 %699, %v167_v23   ;;  %v162_v33 = vld [vmem:[%s959_s1 + $0x18] sm:$0xff]  ;;  %s136_s29 = scalar_lea.vmem [#allocation2], %s135_s28 }
  0x17   : > { %v158_v4 = vld [vmem:[%s843_s4 + $0x78] sm:$0xff]  ;;  %v157_v5 = vld [vmem:[%s843_s4 + $0x70] sm:$0xff]  ;;  %v156_v7 = vld [vmem:[%s843_s4 + $0x68] sm:$0xff]  ;;  %s497_s30 = sshll.u32 %s136_s29, 4  ;;  %s498_s30 = int_to_ptr.vmem [resolvable:$true] %s497_s30 }
  0x18   : > { %607 = vmatprep.subr.msk.mxu0 %vm179_vm0, %v158_v4  ;;  %v155_v8 = vld [vmem:[%s843_s4 + $0x60] sm:$0xff]  ;;  %v154_v9 = vld [vmem:[%s843_s4 + $0x58] sm:$0xff]  ;;  %v153_v10 = vld [vmem:[%s843_s4 + $0x50] sm:$0xff]  ;;  %s700_s7 = scalar_lea.vmem %s498_s30, 16  ;;  %p707_p0 = scmp.lt.s32.totalorder %s498_s30, %s705_s13 }
  0x19   : > { %171 = vperm.xlu0 %698, %v164_v3   ;;  %608 = vmatpush3.xpose.msk.msra.mxu0 %vm179_vm0, %v158_v4  ;;  %v152_v11 = vld [vmem:[%s843_s4 + $0x48] sm:$0xff]  ;;  %v151_v12 = vld [vmem:[%s843_s4 + $0x40] sm:$0xff]  ;;  %v150_v13 = vld [vmem:[%s843_s4 + $0x38] sm:$0xff]  ;;  %p701_p11 = scmp.ne.s32.totalorder %s498_s30, %s700_s7  ;;  %p708_p1 = scmp.lt.s32.totalorder %s706_s14, %s700_s7 }
  0x1a   : > { %609 = vmatprep.subr.msk.mxu0 %vm179_vm0, %v157_v5  ;;  %v149_v14 = vld [vmem:[%s843_s4 + $0x30] sm:$0xff]  ;;  %v148_v15 = vld [vmem:[%s843_s4 + $0x28] sm:$0xff]  ;;  %v147_v16 = vld [vmem:[%s843_s4 + $0x20] sm:$0xff]  ;;  %313 = vperm.xlu1 %699, %v166_v24  }
  0x1b   : > { %v146_v17 = vld [vmem:[%s843_s4 + $0x18] sm:$0xff]  ;;  %v145_v18 = vld [vmem:[%s843_s4 + $0x10] sm:$0xff]  ;;  %v144_v19 = vld [vmem:[%s843_s4 + $0x8] sm:$0xff]  ;;  %p702_p12 = pnand %p701_p11, %p816_p5  ;;  %p709_p2 = por %p708_p1, %p707_p0 }
  0x1c   : > { %v143_v20 = vld [vmem:[%s843_s4] sm:$0xff] }
  0x1d   : > { %407 = vperm.xlu0 %698, %v168_v6   ;;  %610 = vmatpush3.xpose.msk.msra.mxu0 %vm179_vm0, %v157_v5  ;;  %p703_p13 = pneg %p702_p12 }
  0x1e   : > { %611 = vmatprep.subr.msk.mxu0 %vm179_vm0, %v156_v7 }
  0x1f   : > { %p710_p3 = pnand %p709_p2, %p703_p13 }
  0x21   : > { %612 = vmatpush3.xpose.msk.msra.mxu0 %vm179_vm0, %v156_v7 }
  0x22   : > { %613 = vmatprep.subr.msk.mxu0 %vm179_vm0, %v155_v8 }
  0x25   : > { %614 = vmatpush3.xpose.msk.msra.mxu0 %vm179_vm0, %v155_v8 }
  0x26   : > { %615 = vmatprep.subr.msk.mxu0 %vm179_vm0, %v154_v9 }
  0x29   : > { %616 = vmatpush3.xpose.msk.msra.mxu0 %vm179_vm0, %v154_v9 }
  0x2a   : > { %617 = vmatprep.subr.msk.mxu0 %vm179_vm0, %v153_v10 }
  0x2d   : > { %618 = vmatpush3.xpose.msk.msra.mxu0 %vm179_vm0, %v153_v10 }
  0x2e   : > { %619 = vmatprep.subr.msk.mxu0 %vm179_vm0, %v152_v11 }
  0x31   : > { %620 = vmatpush3.xpose.msk.msra.mxu0 %vm179_vm0, %v152_v11 }
  0x32   : > { %621 = vmatprep.subr.msk.mxu0 %vm179_vm0, %v151_v12 }
  0x35   : > { %622 = vmatpush3.xpose.msk.msra.mxu0 %vm179_vm0, %v151_v12 }
  0x36   : > { %623 = vmatprep.subr.msk.mxu0 %vm179_vm0, %v150_v13 }
  0x39   : > { %624 = vmatpush3.xpose.msk.msra.mxu0 %vm179_vm0, %v150_v13 }
  0x3a   : > { %625 = vmatprep.subr.msk.mxu0 %vm179_vm0, %v149_v14 }
  0x3d   : > { %626 = vmatpush3.xpose.msk.msra.mxu0 %vm179_vm0, %v149_v14 }
  0x3e   : > { %627 = vmatprep.subr.msk.mxu0 %vm179_vm0, %v148_v15 }
  0x41   : > { %628 = vmatpush3.xpose.msk.msra.mxu0 %vm179_vm0, %v148_v15 }
  0x42   : > { %629 = vmatprep.subr.msk.mxu0 %vm179_vm0, %v147_v16 }
  0x45   : > { %630 = vmatpush3.xpose.msk.msra.mxu0 %vm179_vm0, %v147_v16 }
  0x46   : > { %631 = vmatprep.subr.msk.mxu0 %vm179_vm0, %v146_v17 }
  0x49   : > { %632 = vmatpush3.xpose.msk.msra.mxu0 %vm179_vm0, %v146_v17 }
  0x4a   : > { %633 = vmatprep.subr.msk.mxu0 %vm179_vm0, %v145_v18 }
  0x4d   : > { %634 = vmatpush3.xpose.msk.msra.mxu0 %vm179_vm0, %v145_v18 }
  0x4e   : > { %635 = vmatprep.subr.msk.mxu0 %vm179_vm0, %v144_v19 }
  0x51   : > { %636 = vmatpush3.xpose.msk.msra.mxu0 %vm179_vm0, %v144_v19 }
  0x52   : > { %637 = vmatprep.subr.msk.mxu0 %vm179_vm0, %v143_v20 }
  0x55   : > { %638 = vmatpush3.xpose.msk.msra.mxu0 %vm179_vm0, %v143_v20 }
  0x58   : > { %640 = vmatmul.mubr.msk.f32.vlgmr.msra.gmra.mxu0 %vm179_vm0, %v160_v21 }
  0x90   : > { %v177_v25 = vpop.permute.xlu0 %176 }
  0x91   : > { %v319_v35 = vpop.permute.xlu1 %318 }
  0x94   : > { %v172_v28 = vpop.permute.xlu0 %171 }
  0x95   : > { %v314_v38 = vpop.permute.xlu1 %313 }
  0x98   : > { %v408_v44 = vpop.permute.xlu0 %407 }
 0x118   : > { %v641_v26 = vpop.f32.mrf.mxu0 }
 0x119   : > { %v306_v27 = vadd.f32 %v641_v26, %v177_v25 }
 0x11a   : > { %v300_v29 = vpop.f32.mrf.mxu0 }
 0x11b   : > { %v310_v30 = vmax.f32 %v306_v27, 0.0  ;;  %v301_v31 = vadd.f32 %v300_v29, %v172_v28 }
 0x11d   : > { %v309_v32 = vmax.f32 %v301_v31, 0.0  ;;  %642 = vmatprep.subr.mxu1 %v310_v30 }
 0x11e   : > { %643 = vmatpush3.msra.mxu1 %v310_v30 }
 0x11f   : > { %644 = vmatprep.subr.mxu1 %v309_v32 }
 0x120   : > { %645 = vmatpush3.msra.mxu1 %v309_v32 }
 0x121   : > { %647 = vmatmul.mubr.msk.f32.vlgmr.msra.gmra.mxu1 %vm321_vm1, %v162_v33  ;;  %649 = vmatprep.subr.mxu1 %v763_v34 }
 0x122   : > { %653 = vmatprep.mubr.msk.f32.mxu1 %vm764_vm2, %v763_v34 }
 0x1e1   : > { %v648_v36 = vpop.f32.mrf.mxu1 }
 0x1e2   : > { %v400_v37 = vadd.f32 %v648_v36, %v319_v35 }
 0x1e3   : > { %v394_v39 = vpop.f32.mrf.mxu1 }
 0x1e4   : > { %v404_v40 = vmax.f32 %v400_v37, 0.0  ;;  %v395_v41 = vadd.f32 %v394_v39, %v314_v38 }
 0x1e6   : > { %v403_v42 = vmax.f32 %v395_v41, 0.0  ;;  %650 = vmatpush3.msra.mxu1 %v404_v40 }
 0x1e7   : > { %651 = vmatprep.subr.mxu1 %v763_v34 }
 0x1e8   : > { %652 = vmatpush3.msra.mxu1 %v403_v42 }
 0x1e9   : > { %654 = vmatmul.mubr.msk.f32.vlgmr.msra.gmra.mxu1 %vm321_vm1, %v163_v43 }
 0x2a9   : > { %v479_v45 = vpop.f32.mrf.mxu1 }
 0x2aa   : > { %v480_v46 = vadd.f32 %v479_v45, %v408_v44 }
 0x2ab   : > { %v655_v47 = vpop.f32.mrf.mxu1 }
 0x2ac   : > { %483 = vst [vmem:[%s136_s29] sm:$0x1] %v480_v46 }
 0x2ad   : > { %713 = shalt.err (!%p710_p3)
}
 0x2ae   : > { %s714_s21 = scalar_lea.hbm %s923_s5, 16  ;;  %s718_s22 = scalar_lea.hbm %s960_s2, 32 }
 0x2af   : > { %p715_p4 = scmp.ne.s32.totalorder %s923_s5, %s714_s21  ;;  %p719_p9 = scmp.lt.s32.totalorder %s923_s5, %s960_s2 }
 0x2b0   : > { %p720_p10 = scmp.lt.s32.totalorder %s718_s22, %s714_s21 }
 0x2b1   : > { %p716_p7 = pnand %p715_p4, %p816_p5 }
 0x2b2   : > { %p721_p11 = por %p720_p10, %p719_p9 }
 0x2b3   : > { %p717_p8 = pneg %p716_p7 }
 0x2b5   : > { %p722_p12 = pnand %p721_p11, %p717_p8 }
 0x2b7   : > { %725 = shalt.err (!%p722_p12)
}
 0x2b8   : > { %656 = dma.vmem_to_hbm [thread:$0]  (%p816_p5), %s498_s30, 16, %s923_s5, %s485_s6  }
 0x2b9 PF: > { %p662_p13 = scmp.ge.s32.totalorder %s760_s12, 2  ;;  %s509_s25 = sand.u32 1, %s748_s9  }
 0x2ba   : > { %s510_s26 = scalar_lea.sflag [#allocation3], %s509_s25 }
 0x2bb   : > { %p659_p0 = pnand %p662_p13, %p820_p6 }
 0x2bd   : > { %p660_p1 = pneg %p659_p0 }
 0x2bf   : > { %743 = dma.done.wait (%p660_p1), %s510_s26, 16  }
 0x2c0   : > { %745 = vsyncadd (%p660_p1), %s510_s26, 4294967280  ;;  %p12_p2 = scmp.ge.s32.totalorder %s804_s15, 4   ;;  %s963_s9 = smov %s752_s10 }
 0x2c1   : > { %s964_s10 = smov %s756_s11  ;;  %s965_s11 = smov %s814_s18 }
 0x2c2   : > { %s966_s12 = smov %s804_s15  ;;  %14 = sbr.rel (!%p12_p2) target bundleno = 3 (0x3), region = 63 }
 0x2c7   :  { %514 = vsyncpa [#allocation3], 1 }
 0x2c8   :  { %516 = vsyncpa [#allocation3 + $0x1], 1 }

</bundles_post_ra>
